<compile_context>
chip_gen: v7x
topology: tpu7x:2x2x1
jax: 0.10.0
libtpu: 0.0.40
codegen_flags: <defaults>
</compile_context>

<pallas_src>
import functools

import jax
import jax.numpy as jnp
from jax import lax
from jax.experimental import pallas as pl
from jax.experimental.pallas import tpu as pltpu

GAMMA = 2.0
EPS = 1e-7  # kept for parity with the PyTorch module; unused in forward (same as PyTorch)


def _per_row_ce_kernel(logits_ref, targets_ref, ce_ref, *, n_total):
    """Writes per-row cross-entropy for this tile (0.0 for padded rows)."""
    i = pl.program_id(0)
    x = logits_ref[...]                                   # (TM, C), native dtype (f32 / bf16)
    tm, c = x.shape

    row0 = pl.multiple_of(i * tm, tm & -tm)               # i*tm is a multiple of 2^k | tm
    t = targets_ref[pl.ds(row0, tm), :]                   # (TM, 1) int32, resident slice

    # Row-validity mask for the (possibly partial) last tile.
    row_ids = row0 + lax.broadcasted_iota(jnp.int32, (tm, 1), 0)     # (TM, 1)
    valid = row_ids < n_total                                        # (TM, 1) bool

    # Max + one-hot pick in the input dtype (bf16-native on v6e/v7x).
    m = jnp.max(x, axis=-1, keepdims=True)                           # (TM, 1)
    col_ids = lax.broadcasted_iota(jnp.int32, (tm, c), 1)            # (TM, C)
    # Gather logits[i, targets[i]] via compare+select (no dynamic gather on TPU);
    # exact regardless of dtype since exactly one element per row survives.
    picked = jnp.sum(jnp.where(col_ids == t, x, 0), axis=-1, keepdims=True)   # (TM, 1)

    # f32 only where it matters numerically: the shifted exp / log path.
    e = jnp.exp((x - m).astype(jnp.float32))                                  # (TM, C) f32
    lse = m.astype(jnp.float32) + jnp.log(jnp.sum(e, axis=-1, keepdims=True)) # (TM, 1) f32
    ce = lse - picked.astype(jnp.float32)                                     # (TM, 1) f32

    # Padded rows (garbage logits / zero-padded targets) contribute exactly 0.
    ce_ref[...] = jnp.where(valid, ce, 0.0)


def _vmem_capacity_bytes():
    try:
        cap = getattr(pltpu.get_tpu_info(), "vmem_capacity_bytes", None)
        if cap:
            return int(cap)
    except Exception:
        pass
    return 128 * 1024 * 1024  # v5e/v6e default


def focal_loss(logits, targets, *, gamma=GAMMA, block_rows=512):
    """logits: (N, C) float32 or bfloat16; targets: (N,) integer class indices.

    Matches torch FocalLoss(gamma)(logits, targets) forward (CE reduction='mean').
    NOTE: production shapes should have C >= 128 for lane-dense vregs; small C
    (e.g. 16) still runs correctly but uses only C/128 of each vreg.
    """
    n, c = logits.shape
    itemsize = jnp.dtype(logits.dtype).itemsize

    # --- tile sizing from the working set, not just the input bytes ------------
    # Per element live in VMEM (approx): double-buffered native input (2*itemsize)
    # + f32 exp tile + int32 iota + select temporaries (~16 B with margin).
    per_elem_bytes = 2 * itemsize + 16
    vmem_cap = _vmem_capacity_bytes()                       # 64 MiB on v7x, 128 MiB on v5e/v6e
    ws_budget = min(vmem_cap // 3, 40 * 1024 * 1024)        # headroom for out/targets/scratch
    sublane = 8 * max(1, 4 // itemsize)                     # 8 rows f32, 16 rows bf16
    tm_cap = max(sublane, (ws_budget // max(1, c * per_elem_bytes)) // sublane * sublane)
    tm = min(block_rows, tm_cap)
    if n <= tm:
        tm = n                                              # full-dim block is always legal
    else:
        tm = max(sublane, (tm // sublane) * sublane)
    # TODO(synk): for very large C (a single (TM, C) tile no longer fits VMEM), add a
    # second grid axis over C with a streaming/online logsumexp accumulator (flash-style).
    # TODO(synk): for small C (<128), fold 128/C rows into the lane axis in the wrapper
    # for lane-dense vregs; current layout is correct but lane-sparse.

    grid = pl.cdiv(n, tm)
    n_pad = grid * tm

    # Targets: one untiled VMEM-resident (n_pad, 1) int32 array, sliced in-kernel.
    # TODO(synk): for very large N (>~64K rows) tile targets again to bound its VMEM footprint.
    targets_pad = jnp.pad(targets.astype(jnp.int32), (0, n_pad - n)).reshape(n_pad, 1)

    vmem_limit = int(min(vmem_cap * 3 // 4, 96 * 1024 * 1024))   # ~48 MiB on v7x, 96 MiB v5e/v6e

    kernel = functools.partial(_per_row_ce_kernel, n_total=n)

    per_row_ce = pl.pallas_call(
        kernel,
        out_shape=jax.ShapeDtypeStruct((n_pad, 1), jnp.float32),
        grid_spec=pltpu.PrefetchScalarGridSpec(
            num_scalar_prefetch=0,
            grid=(grid,),
            in_specs=[
                pl.BlockSpec((tm, c), lambda i: (i, 0)),
                pl.BlockSpec(memory_space=pltpu.MemorySpace.VMEM),   # whole targets array, resident
            ],
            out_specs=pl.BlockSpec((tm, 1), lambda i: (i, 0)),
        ),
        compiler_params=pltpu.CompilerParams(
            dimension_semantics=("parallel",),        # no cross-step state -> megacore-friendly
            vmem_limit_bytes=vmem_limit,
        ),
        cost_estimate=pl.CostEstimate(
            flops=6 * n * c,
            transcendentals=n * c + n,
            bytes_accessed=n * c * itemsize + 4 * n_pad + 4 * n_pad,
        ),
    )(logits, targets_pad)

    # Tiny scalar epilogue in plain JAX (negligible next to the (N, C) kernel).
    mean_ce = jnp.sum(per_row_ce, dtype=jnp.float32) / jnp.float32(n)   # reduction='mean'
    p = jnp.exp(-mean_ce)
    omp = 1.0 - p
    if gamma == 2.0:
        modulator = omp * omp            # avoid float pow (exp/log round-trip)
    elif gamma == 1.0:
        modulator = omp
    else:
        modulator = omp ** jnp.float32(gamma)
    return modulator * mean_ce


def _focal_loss_ref(logits, targets, gamma=GAMMA):
    # Pure-JAX reference for verification.
    logits = logits.astype(jnp.float32)
    logz = jax.nn.logsumexp(logits, axis=-1)
    picked = jnp.take_along_axis(logits, targets[:, None].astype(jnp.int32), axis=-1)[:, 0]
    logp = jnp.mean(logz - picked)
    p = jnp.exp(-logp)
    return (1.0 - p) ** gamma * logp


if __name__ == "__main__":
    key = jax.random.PRNGKey(0)
    k1, k2, k3, k4 = jax.random.split(key, 4)

    # Case 1: tiny single-tile (batch=8, classes=16), f32.
    N1, C1 = 8, 16
    logits1 = jax.random.normal(k1, (N1, C1), dtype=jnp.float32)
    targets1 = jax.random.randint(k2, (N1,), 0, C1, dtype=jnp.int32)
    out1 = jax.block_until_ready(focal_loss(logits1, targets1))
    ref1 = _focal_loss_ref(logits1, targets1)
    assert jnp.allclose(out1, ref1, rtol=1e-5, atol=1e-6), (out1, ref1)

    # Case 2: multi-tile grid with a partial last tile (exercises masking + parallel grid).
    N2, C2 = 200, 16
    logits2 = jax.random.normal(k3, (N2, C2), dtype=jnp.float32)
    targets2 = jax.random.randint(k4, (N2,), 0, C2, dtype=jnp.int32)
    out2 = jax.block_until_ready(focal_loss(logits2, targets2, block_rows=64))
    ref2 = _focal_loss_ref(logits2, targets2)
    assert jnp.allclose(out2, ref2, rtol=1e-5, atol=1e-6), (out2, ref2)

    # Case 3: bf16 ingestion, bf16-native max/pick, f32 exp/log path.
    logits3 = logits2.astype(jnp.bfloat16)
    out3 = jax.block_until_ready(focal_loss(logits3, targets2, block_rows=64))
    ref3 = _focal_loss_ref(logits3, targets2)
    assert jnp.allclose(out3, ref3, rtol=2e-2, atol=1e-2), (out3, ref3)

    print("KERNEL_OK")
</pallas_src>

<mosaic_0001>
module attributes {stable_mosaic.version = 11 : i64} {
  func.func @_per_row_ce_kernel(%arg0: i32, %arg1: memref<8x16xf32, #tpu.memory_space<vmem>>, %arg2: memref<8x1xi32, #tpu.memory_space<vmem>>, %arg3: memref<8x1xf32, #tpu.memory_space<vmem>>) attributes {dimension_semantics = [#tpu.dimension_semantics<parallel>], iteration_bounds = array<i64: 1>, scalar_prefetch = 0 : i64, scratch_operands = 0 : i64, tpu.core_type = #tpu.core_type<tc>, window_params = [{transform_indices = @transform_0, window_bounds = array<i64: 8, 16>}, {pipeline_mode = #tpu.pipeline_mode<synchronous>, transform_indices = @transform_1, window_bounds = array<i64: 8, 1>}, {transform_indices = @transform_2, window_bounds = array<i64: 8, 1>}]} {
    %c0 = arith.constant 0 : index
    %c0_0 = arith.constant 0 : index
    %0 = vector.load %arg1[%c0, %c0_0] : memref<8x16xf32, #tpu.memory_space<vmem>>, vector<8x16xf32>
    %c8_i32 = arith.constant 8 : i32
    %1 = arith.muli %arg0, %c8_i32 : i32
    %2 = tpu.assume_multiple %1, 8 : i32
    %3 = arith.index_cast %2 : i32 to index
    %c0_1 = arith.constant 0 : index
    %4 = vector.load %arg2[%3, %c0_1] : memref<8x1xi32, #tpu.memory_space<vmem>>, vector<8x1xi32>
    %5 = tpu.iota {dimensions = array<i32: 0>} : vector<8x1xi32>
    %6 = vector.broadcast %2 : i32 to vector<8x1xi32>
    %7 = arith.addi %6, %5 : vector<8x1xi32>
    %c8_i32_2 = arith.constant 8 : i32
    %8 = vector.broadcast %c8_i32_2 : i32 to vector<8x1xi32>
    %9 = arith.cmpi slt, %7, %8 : vector<8x1xi32>
    %cst = arith.constant dense<0xFF800000> : vector<8xf32>
    %10 = vector.multi_reduction <maximumf>, %0, %cst [1] : vector<8x16xf32> to vector<8xf32>
    %11 = vector.shape_cast %10 : vector<8xf32> to vector<8x1xf32>
    %12 = tpu.iota {dimensions = array<i32: 1>} : vector<8x16xi32>
    %13 = vector.broadcast %4 : vector<8x1xi32> to vector<8x16xi32>
    %14 = arith.cmpi eq, %12, %13 : vector<8x16xi32>
    %c0_i32 = arith.constant 0 : i32
    %15 = arith.sitofp %c0_i32 : i32 to f32
    %16 = vector.broadcast %15 : f32 to vector<8x16xf32>
    %17 = arith.select %14, %0, %16 : vector<8x16xi1>, vector<8x16xf32>
    %cst_3 = arith.constant dense<0.000000e+00> : vector<8xf32>
    %18 = vector.multi_reduction <add>, %17, %cst_3 [1] : vector<8x16xf32> to vector<8xf32>
    %19 = vector.shape_cast %18 : vector<8xf32> to vector<8x1xf32>
    %20 = vector.broadcast %11 : vector<8x1xf32> to vector<8x16xf32>
    %21 = arith.subf %0, %20 : vector<8x16xf32>
    %22 = math.exp %21 : vector<8x16xf32>
    %cst_4 = arith.constant dense<0.000000e+00> : vector<8xf32>
    %23 = vector.multi_reduction <add>, %22, %cst_4 [1] : vector<8x16xf32> to vector<8xf32>
    %24 = vector.shape_cast %23 : vector<8xf32> to vector<8x1xf32>
    %25 = math.log %24 : vector<8x1xf32>
    %26 = arith.addf %11, %25 : vector<8x1xf32>
    %27 = arith.subf %26, %19 : vector<8x1xf32>
    %cst_5 = arith.constant 0.000000e+00 : f32
    %28 = vector.broadcast %cst_5 : f32 to vector<8x1xf32>
    %29 = arith.select %9, %27, %28 : vector<8x1xi1>, vector<8x1xf32>
    %c0_6 = arith.constant 0 : index
    %c0_7 = arith.constant 0 : index
    %30 = vector.load %arg3[%c0_6, %c0_7] : memref<8x1xf32, #tpu.memory_space<vmem>>, vector<8x1xf32>
    tpu.vector_store %arg3[%c0_6, %c0_7], %29 {strides = array<i32>} : memref<8x1xf32, #tpu.memory_space<vmem>>, vector<8x1xf32>,
    return
  }
  func.func @transform_0(%arg0: i32) -> (i32, i32) {
    %c0_i32 = arith.constant 0 : i32
    %c0_i32_0 = arith.constant 0 : i32
    return %arg0, %c0_i32 : i32, i32
  }
  func.func @transform_1(%arg0: i32) -> (i32, i32) {
    %c0_i32 = arith.constant 0 : i32
    %c0_i32_0 = arith.constant 0 : i32
    %c0_i32_1 = arith.constant 0 : i32
    return %c0_i32, %c0_i32_0 : i32, i32
  }
  func.func @transform_2(%arg0: i32) -> (i32, i32) {
    %c0_i32 = arith.constant 0 : i32
    %c0_i32_0 = arith.constant 0 : i32
    return %arg0, %c0_i32 : i32, i32
  }
}

</mosaic_0001>

<bundles_post_ra>
// kernel: tpu_custom_call.1
= control target key start
LH: loop header
LB: loop body
LE: loop exit
PB: predicated region body
PF: predicated region fallthrough
CT: control target
= control target key end

     0   :  { %7 = vsyncpa [#allocation3], 0  ;;  %s227_s0 = inlined_call_operand.hbm [shape: f32[8,16], index: 0, kind: input, shape index: {}]   ;;  %s228_s1 = inlined_call_operand.hbm [shape: s32[8,1], index: 1, kind: input, shape index: {}]   ;;  %s229_s2 = inlined_call_operand.hbm [shape: f32[8,1], index: 2, kind: output, shape index: {}]  }
   0x1   :  { %8 = vsyncpa [#allocation6], 0 }
   0x2   :  { %9 = vsyncpa [#allocation4], 0  ;;  %s169_s9 = smov [#allocation2]   ;;  %s170_s11 = smov [#allocation5]  }
   0x3   :  { %s16_s10 = sshll.u32 %s169_s9, 4  ;;  %s26_s12 = sshll.u32 %s170_s11, 4  ;;  %s17_s10 = int_to_ptr.vmem [resolvable:$true] %s16_s10  ;;  %s27_s12 = int_to_ptr.vmem [resolvable:$true] %s26_s12 }
   0x4   :  { %s97_s15 = scalar_lea.hbm %s227_s0, 128 }
   0x5   :  { %p98_p0 = scmp.ne.s32.totalorder %s227_s0, %s97_s15  ;;  %p101_p1 = scmp.lt.u32.totalorder %s97_s15, %s227_s0 }
   0x7   :  { %p103_p2 = pnand %p101_p1, %p98_p0 }
   0x9   :  { %106 = shalt.err (!%p103_p2)
}
   0xa   :  { %s107_s20 = scalar_lea.vmem %s17_s10, 128  ;;  %p112_p4 = scmp.lt.s32.totalorder %s17_s10, %s17_s10 }
   0xb   :  { %p108_p3 = scmp.ne.s32.totalorder %s17_s10, %s107_s20  ;;  %p113_p5 = scmp.lt.s32.totalorder %s107_s20, %s107_s20 }
   0xd   :  { %p114_p6 = por %p113_p5, %p112_p4 }
   0xf   :  { %p115_p7 = pnand %p114_p6, %p108_p3 }
  0x11   :  { %118 = shalt.err (!%p115_p7)
}
  0x12   :  { %19 = dma.hbm_to_vmem [thread:$0]  %s227_s0, 128, %s17_s10, [#allocation3]  }
  0x13   :  { %s119_s25 = scalar_lea.hbm %s228_s1, 128 }
  0x14   :  { %p120_p8 = scmp.ne.s32.totalorder %s228_s1, %s119_s25  ;;  %p123_p9 = scmp.lt.u32.totalorder %s119_s25, %s228_s1 }
  0x16   :  { %p125_p10 = pnand %p123_p9, %p120_p8 }
  0x18   :  { %128 = shalt.err (!%p125_p10)
}
  0x19   :  { %s129_s30 = scalar_lea.vmem %s27_s12, 128  ;;  %p134_p12 = scmp.lt.s32.totalorder %s27_s12, %s27_s12 }
  0x1a   :  { %p130_p11 = scmp.ne.s32.totalorder %s27_s12, %s129_s30  ;;  %p135_p13 = scmp.lt.s32.totalorder %s129_s30, %s129_s30 }
  0x1c   :  { %p136_p0 = por %p135_p13, %p134_p12 }
  0x1e   :  { %p137_p1 = pnand %p136_p0, %p130_p11 }
  0x20   :  { %140 = shalt.err (!%p137_p1)
}
  0x21   :  { %29 = dma.hbm_to_vmem [thread:$0]  %s228_s1, 128, %s27_s12, [#allocation6]  }
  0x22   :  { %163 = dma.done.wait [#allocation3], 128  }
  0x23   :  { %164 = vsyncadd [#allocation3], 4294967168 }
  0x24   :  { %165 = dma.done.wait [#allocation6], 128  }
  0x25   :  { %166 = vsyncadd [#allocation6], 4294967168  ;;  %v171_v0 = vmov 0   ;;  %vm45_vm0 = vcmask 130048   ;;  %v36_v1 = vld [vmem:[#allocation2] sm:$0xff]  ;;  %v39_v3 = vld [vmem:[#allocation5] sm:$0xff]  ;;  %v49_v7 = vlaneseq }
  0x26   :  { %92 = vset.pattern.permute.xlu0 %v171_v0  ;;  %v46_v2 = vsel %vm45_vm0, %v36_v1, -inf  ;;  %s172_s1 = smov [#allocation7]   ;;  %vm70_vm2 = vcmask 7168  }
  0x27   :  { %47 = vmax.xlane.f32.xlu0 %v46_v2  ;;  %v50_v8 = vand.u32 127, %v49_v7  ;;  %s78_s4 = sshll.u32 %s172_s1, 4  ;;  %s79_s4 = int_to_ptr.vmem [resolvable:$true] %s78_s4 }
  0x28   :  { %s141_s5 = scalar_lea.vmem %s79_s4, 128  ;;  %p146_p3 = scmp.lt.s32.totalorder %s79_s4, %s79_s4 }
  0x29   :  { %p142_p2 = scmp.ne.s32.totalorder %s79_s4, %s141_s5  ;;  %p147_p4 = scmp.lt.s32.totalorder %s141_s5, %s141_s5 }
  0x2b   :  { %p148_p5 = por %p147_p4, %p146_p3 }
  0x2d   :  { %p149_p6 = pnand %p148_p5, %p142_p2 }
  0x3d   :  { %52 = vperm.xlu0 %92, %v39_v3  }
  0xb4   :  { %v48_v4 = vpop.xlane.xlu0 %47 }
  0xb5   :  { %v59_v5 = vsub.f32 %v36_v1, %v48_v4 }
  0xb7   :  { %v60_v6 = vmul.f32 1.442695, %v59_v5 }
  0xb9   :  { %93 = vpow2.f32 %v60_v6 }
  0xbc   :  { %v53_v9 = vpop.permute.xlu0 %52 }
  0xbd   :  { %vm54_vm1 = vcmp.eq.s32.totalorder %v50_v8, %v53_v9 }
  0xbe   :  { %v55_v11 = vsel %vm54_vm1, %v36_v1, 0.0 }
  0xbf   :  { %v56_v13 = vsel %vm45_vm0, %v55_v11, 0.0 }
  0xc3   :  { %v94_v10 = vpop.eup %93 }
  0xc4   :  { %v62_v12 = vsel %vm45_vm0, %v94_v10, 0.0 }
  0xc5   :  { %63 = vadd.xlane.f32.xlu1 %v62_v12 }
  0xc9   :  { %57 = vadd.xlane.f32.xlu1 %v56_v13 }
 0x152   :  { %v64_v14 = vpop.xlane.xlu1 %63 }
 0x153   :  { %95 = vlog2.f32 %v64_v14 }
 0x156   :  { %v58_v17 = vpop.xlane.xlu1 %57 }
 0x15d   :  { %v96_v15 = vpop.eup %95 }
 0x15e   :  { %v66_v16 = vmul.f32 0.6931472, %v96_v15 }
 0x160   :  { %v67_v18 = vadd.f32 %v66_v16, %v48_v4 }
 0x162   :  { %v68_v19 = vsub.f32 %v67_v18, %v58_v17 }
 0x164   :  { %71 = vst.msk [vmem:[#allocation7] sm:$0xff] %vm70_vm2, %v68_v19 }
 0x165   :  { %152 = shalt.err (!%p149_p6)
}
 0x166   :  { %s153_s8 = scalar_lea.hbm %s229_s2, 128 }
 0x167   :  { %p154_p7 = scmp.ne.s32.totalorder %s229_s2, %s153_s8  ;;  %p157_p8 = scmp.lt.u32.totalorder %s153_s8, %s229_s2 }
 0x169   :  { %p159_p9 = pnand %p157_p8, %p154_p7 }
 0x16b   :  { %162 = shalt.err (!%p159_p9)
}
 0x16c   :  { %81 = dma.vmem_to_hbm [thread:$0]  %s79_s4, 128, %s229_s2, [#allocation4]  }
 0x16d   :  { %167 = dma.done.wait [#allocation4], 128  }
 0x16e   :  { %168 = vsyncadd [#allocation4], 4294967168 }
 0x16f   :  { %85 = vsyncpa [#allocation3], 1 }
 0x170   :  { %86 = vsyncpa [#allocation6], 1 }
 0x171   :  { %87 = vsyncpa [#allocation4], 1 }

</bundles_post_ra>
